<compile_context>
chip_gen: v7x
topology: tpu7x:2x2x1
jax: 0.10.0
libtpu: 0.0.40
codegen_flags: <defaults>
</compile_context>

<pallas_src>
import jax
import jax.numpy as jnp
from jax.experimental import pallas as pl
from jax.experimental.pallas import tpu as pltpu

_LANE = 128


def _mlp_kernel(x_ref, w1_ref, b1_ref, w2_ref, b2_ref, o_ref):
    # x_ref:  (1, Cin, TP)   pixel tile of one batch element (pixels on lanes)
    # w1_ref: (Chid, Cin)    fc1 weight (conv layout, no transpose needed)
    # b1_ref: (Chid, 1)      fc1 bias (column vector, broadcast along lanes)
    # w2_ref: (Cout, Chid)   fc2 weight
    # b2_ref: (Cout, 1)      fc2 bias
    # o_ref:  (1, Cout, TP)
    x = x_ref[0]                                              # (Cin, TP)
    h = jnp.dot(w1_ref[...], x,
                preferred_element_type=jnp.float32) + b1_ref[...]
    # ReLU6 (dropout p=0.0 is the identity)
    h = jnp.minimum(jnp.maximum(h, 0.0), 6.0)
    o = jnp.dot(w2_ref[...], h.astype(w2_ref.dtype),
                preferred_element_type=jnp.float32) + b2_ref[...]
    o_ref[0] = o.astype(o_ref.dtype)


def _round_up(x, m):
    return -(-x // m) * m


def _choose_pixel_tile(P, N, itemsize, cin, chid, cout, *,
                       vmem_live_budget=24 << 20,   # live buffers well under v7x 64 MiB
                       max_tile=32768,
                       min_total_steps=8):
    """Lane-aligned pixel-tile width, budgeted against VMEM and grid-step count."""
    if P <= _LANE:
        # Single block spanning the whole (short) pixel axis — legal block shape.
        return P
    # Per-pixel live VMEM bytes: double-buffered x/out blocks + f32 hidden/out temps.
    per_px = 2 * (cin + cout) * itemsize + 4 * (chid + cout)
    tp = min(max_tile, vmem_live_budget // per_px)
    tp = min(tp, _round_up(P, _LANE))
    tp = max(_LANE, (tp // _LANE) * _LANE)
    # Keep >= min_total_steps total grid steps so both v7x TensorCores get work
    # and the pipeline can still double-buffer for small-batch / small-image cases.
    if N * pl.cdiv(P, tp) < min_total_steps:
        per_img = pl.cdiv(min_total_steps, N)
        cap = max(_LANE, (pl.cdiv(P, per_img) // _LANE) * _LANE)
        tp = min(tp, cap)
    return tp


def mlp_pallas(x_nchw, w1, b1, w2, b2, *, tile_px=None):
    """x_nchw: (N, Cin, H, W). w1: (Chid, Cin), b1: (Chid,), w2: (Cout, Chid), b2: (Cout,)."""
    N, Cin, H, W = x_nchw.shape
    Chid = w1.shape[0]
    Cout = w2.shape[0]
    dtype = x_nchw.dtype
    itemsize = jnp.dtype(dtype).itemsize

    P = H * W
    # Pure reshape (NCHW is already channel-major over contiguous pixels) -> no HBM copy.
    x_pix = x_nchw.reshape(N, Cin, P)

    tp = tile_px if tile_px is not None else _choose_pixel_tile(
        P, N, itemsize, Cin, Chid, Cout)
    grid = (N, pl.cdiv(P, tp))   # ragged last pixel block is masked by Pallas

    b1_col = b1.reshape(Chid, 1).astype(jnp.float32)
    b2_col = b2.reshape(Cout, 1).astype(jnp.float32)

    # Advisory cost: firmly HBM-bandwidth bound (~16 F/B).
    flops = 2 * N * P * (Cin * Chid + Chid * Cout)
    bytes_accessed = (N * P * (Cin + Cout)) * itemsize \
        + (Chid * Cin + Cout * Chid) * jnp.dtype(w1.dtype).itemsize \
        + (Chid + Cout) * 4

    out_pix = pl.pallas_call(
        _mlp_kernel,
        out_shape=jax.ShapeDtypeStruct((N, Cout, P), dtype),
        grid_spec=pltpu.PrefetchScalarGridSpec(
            num_scalar_prefetch=0,
            grid=grid,
            in_specs=[
                pl.BlockSpec((1, Cin, tp), lambda b, j: (b, 0, j)),   # x tile
                pl.BlockSpec((Chid, Cin), lambda b, j: (0, 0)),       # w1 (VMEM-resident)
                pl.BlockSpec((Chid, 1), lambda b, j: (0, 0)),         # b1
                pl.BlockSpec((Cout, Chid), lambda b, j: (0, 0)),      # w2
                pl.BlockSpec((Cout, 1), lambda b, j: (0, 0)),         # b2
            ],
            out_specs=pl.BlockSpec((1, Cout, tp), lambda b, j: (b, 0, j)),
        ),
        compiler_params=pltpu.CompilerParams(
            dimension_semantics=("parallel", "parallel"),
            vmem_limit_bytes=64 * 1024 * 1024,   # explicit: covers v5e 16 MiB / v6e-v7x 32 MiB scoped defaults
        ),
        cost_estimate=pl.CostEstimate(flops=flops, transcendentals=0,
                                      bytes_accessed=bytes_accessed),
    )(x_pix, w1, b1_col, w2, b2_col)

    # Pure reshape back to NCHW (still no transpose).
    return out_pix.reshape(N, Cout, H, W)


def mlp_reference(x_nchw, w1, b1, w2, b2):
    """Pure-JAX reference mirroring the PyTorch forward (1x1 convs as channel matmuls)."""
    N, Cin, H, W = x_nchw.shape
    x = x_nchw.reshape(N, Cin, H * W).astype(jnp.float32)
    h = jnp.einsum("hc,ncp->nhp", w1.astype(jnp.float32), x) \
        + b1.astype(jnp.float32)[None, :, None]
    h = jnp.clip(h, 0.0, 6.0)
    o = jnp.einsum("oh,nhp->nop", w2.astype(jnp.float32), h) \
        + b2.astype(jnp.float32)[None, :, None]
    return o.reshape(N, -1, H, W).astype(x_nchw.dtype)


if __name__ == "__main__":
    # Module config: in_features=4, hidden_features=32, out_features=4 (= in by default)
    N, Cin, H, W = 2, 4, 16, 16
    Chid, Cout = 32, 4

    key = jax.random.PRNGKey(0)
    kx, k1, kb1, k2, kb2 = jax.random.split(key, 5)

    x = jax.random.normal(kx, (N, Cin, H, W), dtype=jnp.float32)

    # fc1: Conv2d(Cin, Chid, 1) weight (Chid, Cin, 1, 1) -> stored squeezed as (Chid, Cin).
    w1 = jax.random.normal(k1, (Chid, Cin), dtype=jnp.float32) * 0.1
    b1 = jax.random.normal(kb1, (Chid,), dtype=jnp.float32) * 0.1
    # fc2: Conv2d(Chid, Cout, 1) -> stored as (Cout, Chid).
    w2 = jax.random.normal(k2, (Cout, Chid), dtype=jnp.float32) * 0.1
    b2 = jax.random.normal(kb2, (Cout,), dtype=jnp.float32) * 0.1

    out = mlp_pallas(x, w1, b1, w2, b2)
    out = jax.block_until_ready(out)
    ref = mlp_reference(x, w1, b1, w2, b2)
    assert out.shape == (N, Cout, H, W), out.shape
    assert jnp.allclose(out, ref, atol=1e-5, rtol=1e-5), \
        float(jnp.max(jnp.abs(out - ref)))

    # Second check: non-power-of-two spatial size (P = 400, not a multiple of 128)
    # exercises the ragged last pixel block (cdiv grid + masked edge stores).
    H2 = W2 = 20
    x2 = jax.random.normal(kx, (N, Cin, H2, W2), dtype=jnp.float32)
    out2 = jax.block_until_ready(mlp_pallas(x2, w1, b1, w2, b2))
    ref2 = mlp_reference(x2, w1, b1, w2, b2)
    assert out2.shape == (N, Cout, H2, W2), out2.shape
    assert jnp.allclose(out2, ref2, atol=1e-5, rtol=1e-5), \
        float(jnp.max(jnp.abs(out2 - ref2)))

    print("KERNEL_OK")
</pallas_src>

<mosaic_0001>
module attributes {stable_mosaic.version = 11 : i64} {
  func.func @_mlp_kernel(%arg0: i32, %arg1: i32, %arg2: memref<1x4x128xf32, #tpu.memory_space<vmem>>, %arg3: memref<32x4xf32, #tpu.memory_space<vmem>>, %arg4: memref<32x1xf32, #tpu.memory_space<vmem>>, %arg5: memref<4x32xf32, #tpu.memory_space<vmem>>, %arg6: memref<4x1xf32, #tpu.memory_space<vmem>>, %arg7: memref<1x4x128xf32, #tpu.memory_space<vmem>>) attributes {dimension_semantics = [#tpu.dimension_semantics<parallel>, #tpu.dimension_semantics<parallel>], iteration_bounds = array<i64: 2, 2>, scalar_prefetch = 0 : i64, scratch_operands = 0 : i64, tpu.core_type = #tpu.core_type<tc>, window_params = [{transform_indices = @transform_0, window_bounds = array<i64: 1, 4, 128>}, {pipeline_mode = #tpu.pipeline_mode<synchronous>, transform_indices = @transform_1, window_bounds = array<i64: 32, 4>}, {pipeline_mode = #tpu.pipeline_mode<synchronous>, transform_indices = @transform_2, window_bounds = array<i64: 32, 1>}, {pipeline_mode = #tpu.pipeline_mode<synchronous>, transform_indices = @transform_3, window_bounds = array<i64: 4, 32>}, {pipeline_mode = #tpu.pipeline_mode<synchronous>, transform_indices = @transform_4, window_bounds = array<i64: 4, 1>}, {transform_indices = @transform_5, window_bounds = array<i64: 1, 4, 128>}]} {
    %c0 = arith.constant 0 : index
    %c0_0 = arith.constant 0 : index
    %c0_1 = arith.constant 0 : index
    %0 = vector.load %arg2[%c0, %c0_0, %c0_1] : memref<1x4x128xf32, #tpu.memory_space<vmem>>, vector<1x4x128xf32>
    %1 = vector.shape_cast %0 : vector<1x4x128xf32> to vector<4x128xf32>
    %c0_2 = arith.constant 0 : index
    %c0_3 = arith.constant 0 : index
    %2 = vector.load %arg3[%c0_2, %c0_3] : memref<32x4xf32, #tpu.memory_space<vmem>>, vector<32x4xf32>
    %cst = arith.constant dense<0.000000e+00> : vector<32x128xf32>
    %3 = tpu.matmul %2, %1, %cst {dimension_numbers = #tpu.dot_dimension_numbers<[1], [0], [0], [1], [0, 0, 1, 1], [], []>} : vector<32x4xf32>, vector<4x128xf32>, vector<32x128xf32> -> vector<32x128xf32>
    %c0_4 = arith.constant 0 : index
    %c0_5 = arith.constant 0 : index
    %4 = vector.load %arg4[%c0_4, %c0_5] : memref<32x1xf32, #tpu.memory_space<vmem>>, vector<32x1xf32>
    %5 = vector.broadcast %4 : vector<32x1xf32> to vector<32x128xf32>
    %6 = arith.addf %3, %5 : vector<32x128xf32>
    %cst_6 = arith.constant 0.000000e+00 : f32
    %7 = vector.broadcast %cst_6 : f32 to vector<32x128xf32>
    %8 = arith.maximumf %6, %7 : vector<32x128xf32>
    %cst_7 = arith.constant 6.000000e+00 : f32
    %9 = vector.broadcast %cst_7 : f32 to vector<32x128xf32>
    %10 = arith.minimumf %8, %9 : vector<32x128xf32>
    %c0_8 = arith.constant 0 : index
    %c0_9 = arith.constant 0 : index
    %11 = vector.load %arg5[%c0_8, %c0_9] : memref<4x32xf32, #tpu.memory_space<vmem>>, vector<4x32xf32>
    %cst_10 = arith.constant dense<0.000000e+00> : vector<4x128xf32>
    %12 = tpu.matmul %11, %10, %cst_10 {dimension_numbers = #tpu.dot_dimension_numbers<[1], [0], [0], [1], [0, 0, 1, 1], [], []>} : vector<4x32xf32>, vector<32x128xf32>, vector<4x128xf32> -> vector<4x128xf32>
    %c0_11 = arith.constant 0 : index
    %c0_12 = arith.constant 0 : index
    %13 = vector.load %arg6[%c0_11, %c0_12] : memref<4x1xf32, #tpu.memory_space<vmem>>, vector<4x1xf32>
    %14 = vector.broadcast %13 : vector<4x1xf32> to vector<4x128xf32>
    %15 = arith.addf %12, %14 : vector<4x128xf32>
    %c0_13 = arith.constant 0 : index
    %c0_14 = arith.constant 0 : index
    %c0_15 = arith.constant 0 : index
    %16 = vector.load %arg7[%c0_13, %c0_14, %c0_15] : memref<1x4x128xf32, #tpu.memory_space<vmem>>, vector<1x4x128xf32>
    %17 = vector.shape_cast %16 : vector<1x4x128xf32> to vector<4x128xf32>
    %18 = vector.shape_cast %15 : vector<4x128xf32> to vector<1x4x128xf32>
    tpu.vector_store %arg7[%c0_13, %c0_14, %c0_15], %18 {strides = array<i32>} : memref<1x4x128xf32, #tpu.memory_space<vmem>>, vector<1x4x128xf32>,
    return
  }
  func.func @transform_0(%arg0: i32, %arg1: i32) -> (i32, i32, i32) {
    %c0_i32 = arith.constant 0 : i32
    %c0_i32_0 = arith.constant 0 : i32
    return %arg0, %c0_i32, %arg1 : i32, i32, i32
  }
  func.func @transform_1(%arg0: i32, %arg1: i32) -> (i32, i32) {
    %c0_i32 = arith.constant 0 : i32
    %c0_i32_0 = arith.constant 0 : i32
    %c0_i32_1 = arith.constant 0 : i32
    return %c0_i32, %c0_i32_0 : i32, i32
  }
  func.func @transform_2(%arg0: i32, %arg1: i32) -> (i32, i32) {
    %c0_i32 = arith.constant 0 : i32
    %c0_i32_0 = arith.constant 0 : i32
    %c0_i32_1 = arith.constant 0 : i32
    return %c0_i32, %c0_i32_0 : i32, i32
  }
  func.func @transform_3(%arg0: i32, %arg1: i32) -> (i32, i32) {
    %c0_i32 = arith.constant 0 : i32
    %c0_i32_0 = arith.constant 0 : i32
    %c0_i32_1 = arith.constant 0 : i32
    return %c0_i32, %c0_i32_0 : i32, i32
  }
  func.func @transform_4(%arg0: i32, %arg1: i32) -> (i32, i32) {
    %c0_i32 = arith.constant 0 : i32
    %c0_i32_0 = arith.constant 0 : i32
    %c0_i32_1 = arith.constant 0 : i32
    return %c0_i32, %c0_i32_0 : i32, i32
  }
  func.func @transform_5(%arg0: i32, %arg1: i32) -> (i32, i32, i32) {
    %c0_i32 = arith.constant 0 : i32
    %c0_i32_0 = arith.constant 0 : i32
    return %arg0, %c0_i32, %arg1 : i32, i32, i32
  }
}

</mosaic_0001>

<bundles_post_ra>
// kernel: tpu_custom_call.1
= control target key start
LH: loop header
LB: loop body
LE: loop exit
PB: predicated region body
PF: predicated region fallthrough
CT: control target
= control target key end

     0   :  { %s1486_s0 = inlined_call_operand.hbm [shape: f32[2,4,256], index: 0, kind: input, shape index: {}]   ;;  %s1487_s1 = inlined_call_operand.hbm [shape: f32[32,4], index: 1, kind: input, shape index: {}]   ;;  %s1488_s2 = inlined_call_operand.hbm [shape: f32[32,1], index: 2, kind: input, shape index: {}]   ;;  %s1489_s3 = inlined_call_operand.hbm [shape: f32[4,32], index: 3, kind: input, shape index: {}]   ;;  %s1490_s4 = inlined_call_operand.hbm [shape: f32[4,1], index: 4, kind: input, shape index: {}]   ;;  %s1491_s5 = inlined_call_operand.hbm [shape: f32[2,4,256], index: 5, kind: output, shape index: {}]  }
   0x1   :  { %1498 = sst [smem:[#allocation16_spill]] %s1487_s1 }
   0x2   :  { %1499 = sst [smem:[#allocation17_spill]] %s1488_s2 }
   0x3   :  { %1500 = sst [smem:[#allocation18_spill]] %s1489_s3 }
   0x4   :  { %1501 = sst [smem:[#allocation19_spill]] %s1491_s5 }
   0x5   :  { %10 = vsyncpa [#allocation3], 0 }
   0x6   :  { %12 = vsyncpa [#allocation3 + $0x1], 0 }
   0x7   :  { %13 = vsyncpa [#allocation6], 0 }
   0x8   :  { %14 = vsyncpa [#allocation9], 0 }
   0x9   :  { %15 = vsyncpa [#allocation4], 0 }
   0xa   :  { %17 = vsyncpa [#allocation4 + $0x1], 0  ;;  %s1155_s18 = smov 0   ;;  %s1157_s19 = smov 0  }
   0xb   :  { %s1159_s20 = smov 0   ;;  %s1161_s21 = smov 0  }
   0xc   :  { %s1163_s22 = smov 0   ;;  %s1165_s23 = smov 0  }
   0xd   :  { %s1167_s24 = smov 0   ;;  %s1169_s25 = smov 0  }
   0xe LB: > { %s1492_s26 = sadd.s32 4294967295, %s1111_s25   ;;  %p674_p0 = scmp.ge.s32.totalorder %s1111_s25, 1  ;;  %s1111_s25 = sphi %s1169_s25, %s23_s25   ;;  %s1107_s24 = sphi %s1167_s24, %s1527_s24   ;;  %s1103_s23 = sphi %s1165_s23, %s1526_s23   ;;  %s1099_s22 = sphi %s1163_s22, %s1525_s22   ;;  %s1095_s21 = sphi %s1161_s21, %s1524_s21   ;;  %s1091_s20 = sphi %s1159_s20, %s1523_s20   ;;  %s1087_s19 = sphi %s1157_s19, %s1522_s19   ;;  %s1083_s18 = sphi %s1155_s18, %s1521_s18  }
   0xf   : > { %p1199_p1 = scmp.eq.s32.totalorder %s1492_s26, 0  ;;  %p180_p2 = scmp.lt.s32.totalorder %s1111_s25, 5 }
  0x10   : > { %s1113_s29 = smov [#allocation5]   ;;  %s1114_s7 = smov [#allocation8]  }
  0x11   : > { %s1502_s27 = scalar_select %p1199_p1, 1, 0 }
  0x12   : > { %p1204_p3 = pnand %p674_p0, %p180_p2  ;;  %s192_s30 = sshll.u32 %s1113_s29, 4  ;;  %s1208_s30 = int_to_ptr.vmem [resolvable:$true] %s192_s30 }
  0x13   : > { %s219_s8 = sshll.u32 %s1114_s7, 4  ;;  %s1115_s9 = smov [#allocation7]   ;;  %s1218_s8 = int_to_ptr.vmem [resolvable:$true] %s219_s8 }
  0x14   : > { %s1503_s28 = scalar_select %p1204_p3, 1, 0 }
  0x15   : > { %p756_p4 = pneg %p1204_p3  ;;  %s1220_s10 = sshll.u32 %s1115_s9, 4  ;;  %s206_s10 = int_to_ptr.vmem [resolvable:$true] %s1220_s10 }
  0x16   : > { %s1505_s1 = sld [smem:[#allocation16_spill]] }
  0x17   : > { %p1214_p5 = pnand %p756_p4, %p1199_p1 }
  0x19   : > { %p1230_p7 = pneg %p1214_p5 }
  0x1c   : > { %s863_s13 = scalar_lea.hbm %s1505_s1, 512 }
  0x1d   : > { %p864_p6 = scmp.ne.s32.totalorder %s1505_s1, %s863_s13  ;;  %p870_p10 = scmp.lt.u32.totalorder %s863_s13, %s1505_s1 }
  0x1f   : > { %p866_p8 = pnand %p1230_p7, %p864_p6 }
  0x21   : > { %p867_p9 = pneg %p866_p8 }
  0x23   : > { %p872_p11 = pnand %p870_p10, %p867_p9 }
  0x25   : > { %875 = shalt.err (!%p872_p11)
}
  0x26   : > { %s876_s7 = scalar_lea.vmem %s1208_s30, 512  ;;  %p884_p2 = scmp.lt.s32.totalorder %s1208_s30, %s1208_s30 }
  0x27   : > { %p877_p12 = scmp.ne.s32.totalorder %s1208_s30, %s876_s7  ;;  %p885_p4 = scmp.lt.s32.totalorder %s876_s7, %s876_s7 }
  0x29   : > { %p879_p13 = pnand %p877_p12, %p1230_p7  ;;  %p886_p6 = por %p885_p4, %p884_p2 }
  0x2b   : > { %p880_p0 = pneg %p879_p13 }
  0x2d   : > { %p887_p8 = pnand %p886_p6, %p880_p0 }
  0x2f   : > { %890 = shalt.err (!%p887_p8)
}
  0x30   : > { %s1116_s9 = smov 128   ;;  %s1117_s11 = smov 8  }
  0x31   : > { %759 = dma.hbm_to_vmem [thread:$0]  (!%p1214_p5), %s1505_s1, 512, %s1208_s30, [#allocation6], %s1116_s9, %s1116_s9, %s1117_s11  }
  0x32   : > { %s1507_s3 = sld [smem:[#allocation18_spill]] }
  0x38   : > { %s891_s17 = scalar_lea.hbm %s1507_s3, 64 }
  0x39   : > { %p892_p9 = scmp.ne.s32.totalorder %s1507_s3, %s891_s17  ;;  %p898_p12 = scmp.lt.u32.totalorder %s891_s17, %s1507_s3 }
  0x3b   : > { %p894_p10 = pnand %p892_p9, %p1230_p7 }
  0x3d   : > { %p895_p11 = pneg %p894_p10 }
  0x3f   : > { %p900_p13 = pnand %p898_p12, %p895_p11 }
  0x41   : > { %903 = shalt.err (!%p900_p13)
}
  0x42   : > { %s904_s30 = scalar_lea.vmem %s1218_s8, 64  ;;  %p912_p6 = scmp.lt.s32.totalorder %s1218_s8, %s1218_s8 }
  0x43   : > { %p905_p0 = scmp.ne.s32.totalorder %s1218_s8, %s904_s30  ;;  %p913_p8 = scmp.lt.s32.totalorder %s904_s30, %s904_s30 }
  0x45   : > { %p907_p2 = pnand %p905_p0, %p1230_p7  ;;  %p914_p9 = por %p913_p8, %p912_p6 }
  0x47   : > { %p908_p4 = pneg %p907_p2 }
  0x49   : > { %p915_p10 = pnand %p914_p9, %p908_p4 }
  0x4b   : > { %918 = shalt.err (!%p915_p10)
}
  0x4c   : > { %765 = dma.hbm_to_vmem [thread:$0]  (!%p1214_p5), %s1507_s3, 64, %s1218_s8, [#allocation9]  }
  0x4d   : > { %s1508_s2 = sld [smem:[#allocation17_spill]] }
  0x53   : > { %s919_s14 = scalar_lea.hbm %s1508_s2, 512 }
  0x54   : > { %p920_p11 = scmp.ne.s32.totalorder %s1508_s2, %s919_s14  ;;  %p926_p0 = scmp.lt.u32.totalorder %s919_s14, %s1508_s2 }
  0x56   : > { %p922_p12 = pnand %p920_p11, %p1230_p7 }
  0x58   : > { %p923_p13 = pneg %p922_p12 }
  0x5a   : > { %p928_p2 = pnand %p926_p0, %p923_p13 }
  0x5c   : > { %931 = shalt.err (!%p928_p2)
}
  0x5d   : > { %s932_s30 = scalar_lea.vmem %s206_s10, 512  ;;  %p940_p9 = scmp.lt.s32.totalorder %s206_s10, %s206_s10 }
  0x5e   : > { %p933_p4 = scmp.ne.s32.totalorder %s206_s10, %s932_s30  ;;  %p941_p10 = scmp.lt.s32.totalorder %s932_s30, %s932_s30 }
  0x60   : > { %p935_p6 = pnand %p933_p4, %p1230_p7  ;;  %p942_p3 = por %p941_p10, %p940_p9 }
  0x62   : > { %p936_p8 = pneg %p935_p6 }
  0x64   : > { %p943_p1 = pnand %p942_p3, %p936_p8 }
  0x66   : > { %946 = shalt.err (!%p943_p1)
}
  0x67   : > { %762 = dma.hbm_to_vmem [thread:$0]  (!%p1214_p5), %s1508_s2, 512, %s206_s10, [#allocation6], %s1116_s9, %s1116_s9, %s1117_s11  }
  0x68   : > { %s1118_s26 = smov [#allocation10]   ;;  %s947_s15 = scalar_lea.hbm %s1490_s4, 64 }
  0x69   : > { %s230_s12 = sshll.u32 %s1118_s26, 4  ;;  %p948_p1 = scmp.ne.s32.totalorder %s1490_s4, %s947_s15  ;;  %s231_s12 = int_to_ptr.vmem [resolvable:$true] %s230_s12 }
  0x6a   : > { %p954_p12 = scmp.lt.u32.totalorder %s947_s15, %s1490_s4 }
  0x6b   : > { %p950_p3 = pnand %p948_p1, %p1230_p7 }
  0x6d   : > { %p951_p11 = pneg %p950_p3 }
  0x6f   : > { %p956_p13 = pnand %p954_p12, %p951_p11 }
  0x71   : > { %959 = shalt.err (!%p956_p13)
}
  0x72   : > { %s960_s10 = scalar_lea.vmem %s231_s12, 64  ;;  %p968_p6 = scmp.lt.s32.totalorder %s231_s12, %s231_s12 }
  0x73   : > { %p961_p0 = scmp.ne.s32.totalorder %s231_s12, %s960_s10  ;;  %p969_p8 = scmp.lt.s32.totalorder %s960_s10, %s960_s10 }
  0x75   : > { %p963_p2 = pnand %p961_p0, %p1230_p7  ;;  %p970_p9 = por %p969_p8, %p968_p6 }
  0x77   : > { %p964_p4 = pneg %p963_p2 }
  0x79   : > { %p971_p10 = pnand %p970_p9, %p964_p4 }
  0x7b   : > { %974 = shalt.err (!%p971_p10)
}
  0x7c   : > { %768 = dma.hbm_to_vmem [thread:$0]  (!%p1214_p5), %s1490_s4, 64, %s231_s12, [#allocation9]  }
  0x7d   : > { %s32_s16 = sadd.s32 1, %s1103_s23  ;;  %s35_s6 = sadd.s32 1, %s1107_s24 }
  0x7e   : > { %p33_p7 = scmp.ge.s32.totalorder %s32_s16, 2  ;;  %s673_s8 = sadd.s32 4294967294, %s1111_s25  }
  0x7f   : > { %s44_s5 = sadd.s32 1, %s1091_s20  ;;  %p51_p1 = scmp.ne.s32.totalorder %s1091_s20, %s1087_s19 }
  0x80   : > { %s1529_s16 = smov (%p33_p7, %s32_s16), 0  ;;  %s1531_s6 = smov (!%p33_p7, %s35_s6), %s1107_s24 }
  0x81   : > { %s40_s26 = ssub.s32 %s1103_s23, %s1529_s16  ;;  %p37_p3 = scmp.ge.s32.totalorder %s1531_s6, 2 }
  0x82   : > { %p57_p11 = scmp.ne.s32.totalorder %s1087_s19, %s1083_s18  ;;  %p52_p12 = scmp.eq.s32.totalorder %s1111_s25, 0 }
  0x83   : > { %s1509_s12 = sadd.s32 4294967295, %s1111_s25   ;;  %s1533_s6 = smov (%p37_p3, %s1531_s6), 0 }
  0x84   : > { %p167_p5 = scmp.eq.s32.totalorder %s1509_s12, 3  ;;  %p1510_p13 = scmp.ne.s32.totalorder %s1502_s27, 0 }
  0x85   : > { %s39_s15 = ssub.s32 %s1107_s24, %s1533_s6  ;;  %p173_p4 = scmp.eq.s32.totalorder %s673_s8, 3 }
  0x86   : > { %p1337_p0 = por %p1510_p13, %p57_p11  ;;  %p1341_p2 = por %p167_p5, %p51_p1 }
  0x87   : > { %s41_s17 = sor.u32 %s40_s26, %s39_s15  ;;  %p1347_p6 = por %p52_p12, %p51_p1 }
  0x88   : > { %s1512_s14 = scalar_select %p1341_p2, 1, 0 }
  0x89   : > { %p42_p8 = scmp.eq.s32.totalorder %s41_s17, 0  ;;  %p1351_p9 = por %p173_p4, %p57_p11 }
  0x8a   : > { %s241_s30 = sand.u32 1, %s1091_s20   ;;  %s681_s10 = sshll.u32 %s1107_s24, 1 }
  0x8b   : > { %s1514_s7 = scalar_select %p1351_p9, 1, 0 }
  0x8c   : > { %s1358_s9 = scalar_select %p42_p8, %s1091_s20, %s44_s5  }
  0x8d   : > { %p781_p10 = scmp.lt.s32.totalorder %s1111_s25, 4  ;;  %s680_s11 = sshll.u32 %s241_s30, 2 }
  0x8e   : > { %s250_s12 = sadd.s32 %s1103_s23, %s681_s10  ;;  %s245_s8 = scalar_lea.vmem [#allocation2], %s680_s11 }
  0x8f   : > { %s682_s1 = sshll.u32 %s250_s12, 6  ;;  %s254_s26 = sshll.u32 %s245_s8, 4  ;;  %s1367_s26 = int_to_ptr.vmem [resolvable:$true] %s254_s26 }
  0x90   : > { %s1365_s3 = scalar_lea.hbm %s1486_s0, %s682_s1  ;;  %p1371_p7 = pnand %p781_p10, %p1347_p6 }
  0x91   : > { %s242_s17 = scalar_lea.sflag [#allocation3], %s241_s30  ;;  %s975_s10 = scalar_lea.hbm %s1365_s3, 64 }
  0x92   : > { %p976_p1 = scmp.ne.s32.totalorder %s1365_s3, %s975_s10  ;;  %p977_p3 = pneg %p1371_p7 }
  0x93   : > { %s980_s11 = scalar_lea.hbm %s1486_s0, 256  ;;  %p981_p5 = scmp.lt.u32.totalorder %s1365_s3, %s1486_s0 }
  0x94   : > { %p978_p11 = pnand %p977_p3, %p976_p1  ;;  %p982_p13 = scmp.lt.u32.totalorder %s980_s11, %s975_s10 }
  0x95   : > { %p984_p6 = scmp.lt.u32.totalorder %s975_s10, %s1365_s3 }
  0x96   : > { %p979_p12 = pneg %p978_p11  ;;  %p983_p4 = por %p982_p13, %p981_p5 }
  0x98   : > { %p985_p8 = por %p984_p6, %p983_p4 }
  0x9a   : > { %p986_p10 = pnand %p985_p8, %p979_p12 }
  0x9c   : > { %989 = shalt.err (!%p986_p10)
}
  0x9d   : > { %s990_s30 = scalar_lea.vmem %s1367_s26, 64  ;;  %s1119_s8 = smov [#allocation2]  }
  0x9e   : > { %p991_p1 = scmp.ne.s32.totalorder %s1367_s26, %s990_s30  ;;  %s995_s15 = sshll.u32 %s1119_s8, 4  ;;  %s996_s15 = int_to_ptr.vmem [resolvable:$false] %s995_s15 }
  0x9f   : > { %s997_s1 = scalar_lea.vmem %s996_s15, 128  ;;  %p998_p2 = scmp.lt.s32.totalorder %s1367_s26, %s996_s15 }
  0xa0   : > { %p993_p11 = pnand %p991_p1, %p977_p3  ;;  %p999_p5 = scmp.lt.s32.totalorder %s997_s1, %s990_s30 }
  0xa2   : > { %p994_p9 = pneg %p993_p11  ;;  %p1000_p13 = por %p999_p5, %p998_p2 }
  0xa4   : > { %p1001_p4 = pnand %p1000_p13, %p994_p9 }
  0xa6   : > { %1004 = shalt.err (!%p1001_p4)
}
  0xa7   : > { %772 = dma.hbm_to_vmem [thread:$0]  (!%p1371_p7), %s1365_s3, 64, %s1367_s26, %s242_s17  }
  0xa8   : > { %p1516_p12 = scmp.ne.s32.totalorder %s1503_s28, 0 }
  0xa9   : > { %s1403_s10 = sand.u32 (!%p1516_p12), 1, %s1087_s19  }
  0xaa   : > { %263 = sbr.rel (%p1516_p12) target bundleno = 643 (0x283), region = 40  ;;  %s684_s2 = sshll.u32 (!%p1516_p12), %s1403_s10, 2 }
  0xab   : > { %s266_s11 = scalar_lea.sflag (!%p1516_p12), [#allocation3], %s1403_s10  ;;  %s269_s29 = scalar_lea.vmem (!%p1516_p12), [#allocation2], %s684_s2 }
  0xb1   : > { %1066 = dma.done.wait (%p1337_p0), %s266_s11, 64  }
  0xb2   : > { %1068 = vsyncadd (%p1337_p0), %s266_s11, 4294967232  ;;  %p1517_p2 = scmp.ne.s32.totalorder %s1502_s27, 0 }
  0xb4   : > { %1070 = dma.done.wait (%p1517_p2), [#allocation6], 1024  }
  0xb5   : > { %1072 = vsyncadd (%p1517_p2), [#allocation6], 4294966272 }
  0xb6   : > { %1074 = dma.done.wait (%p1517_p2), [#allocation9], 128  }
  0xb7   : > { %1076 = vsyncadd (%p1517_p2), [#allocation9], 4294967168  ;;  %v1120_v0 = vmov 0   ;;  %vm354_vm0 = vcmask 1043456   ;;  %vm341_vm1 = vcmask 31744   ;;  %v313_v2 = vld [vmem:[#allocation5] sm:$0xff] }
  0xb8   : > { %861 = vset.pattern.permute.xlu0 %v1120_v0  ;;  %862 = vset.pattern.permute.xlu1 %v1120_v0  ;;  %v312_v1 = vld [vmem:[%s269_s29] sm:$0xf]  ;;  %v314_v3 = vld [vmem:[#allocation5 + $0x8] sm:$0xff]  ;;  %v315_v4 = vld [vmem:[#allocation5 + $0x10] sm:$0xff]  ;;  %v1121_v11 = vmov 0.0|0.0   ;;  %vm1122_vm2 = vmmov 0  }
  0xb9   : > { %711 = vmatprep.subr.msk.mxu0 %vm354_vm0, %v312_v1  ;;  %713 = vmatprep.mubr.msk.f32.mxu0 %vm341_vm1, %v313_v2  ;;  %v317_v5 = vld [vmem:[#allocation7] sm:$0xff]  ;;  %v319_v6 = vld [vmem:[#allocation7 + $0x10] sm:$0xff]  ;;  %v318_v7 = vld [vmem:[#allocation7 + $0x8] sm:$0xff]  ;;  %v1123_v12 = vmov 0.0   ;;  %vm458_vm3 = vcmask 261120   ;;  %s697_s3 = sshll.u32 %s1099_s22, 1 }
  0xba   : > { %712 = vmatpush3.msk.msra.mxu0 %vm354_vm0, %v312_v1  ;;  %323 = vperm.xlu0 %861, %v317_v5   ;;  %v316_v8 = vld [vmem:[#allocation5 + $0x18] sm:$0xff]  ;;  %v452_v10 = vld [vmem:[#allocation10] sm:$0xf]  ;;  %v451_v35 = vld [vmem:[#allocation8] sm:$0xf]  ;;  %s545_s27 = sadd.s32 %s1095_s21, %s697_s3  ;;  %s311_s13 = scalar_lea.vmem [#allocation11], %s684_s2 }
  0xbb   : > { %714 = vmatmul.mubr.msk.f32.vlgmr.msra.gmra.mrb[0].mxu0 %vm341_vm1, %v314_v3  ;;  %333 = vperm.xlu1 %862, %v319_v6   ;;  %v320_v9 = vld [vmem:[#allocation7 + $0x18] sm:$0xff]  ;;  %s698_s28 = sshll.u32 %s545_s27, 6  ;;  %s549_s26 = sshll.u32 %s311_s13, 4  ;;  %s1434_s26 = int_to_ptr.vmem [resolvable:$true] %s549_s26 }
  0xbc   : > { %716 = vmatprep.mubr.msk.f32.mxu0 %vm341_vm1, %v315_v4  ;;  %730 = vmatprep.subr.bf16.mxu1 %v1121_v11  ;;  %s1518_s12 = sld [smem:[#allocation19_spill]]  ;;  %s534_s21 = scalar_lea.sflag [#allocation4], %s1403_s10 }
  0xbd   : > { %727 = vmatprep.mubr.msk.f32.mxu1 %vm1122_vm2, %v1123_v12  ;;  %s1005_s22 = scalar_lea.vmem %s1434_s26, 64  ;;  %p1519_p9 = scmp.ne.s32.totalorder %s1512_s14, 0 }
  0xbe   : > { %328 = vperm.xlu0 %861, %v318_v7   ;;  %p1006_p0 = scmp.ne.s32.totalorder %s1434_s26, %s1005_s22  ;;  %s1124_s8 = smov [#allocation11]  }
  0xbf   : > { %717 = vmatmul.mubr.msk.f32.gmra.mrb[2].mxu0 %vm341_vm1, %v316_v8  ;;  %338 = vperm.xlu1 %862, %v320_v9   ;;  %s1009_s15 = sshll.u32 %s1124_s8, 4  ;;  %s1010_s15 = int_to_ptr.vmem [resolvable:$false] %s1009_s15 }
  0xc0   : > { %p1007_p7 = pnand %p1006_p0, %p1519_p9  ;;  %s1011_s1 = scalar_lea.vmem %s1010_s15, 128 }
  0xc1   : > { %p1012_p6 = scmp.lt.s32.totalorder %s1434_s26, %s1010_s15  ;;  %p1013_p8 = scmp.lt.s32.totalorder %s1011_s1, %s1005_s22 }
  0xc2   : > { %455 = vperm.xlu0 %861, %v452_v10   ;;  %s1432_s30 = scalar_lea.hbm %s1518_s12, %s698_s28  ;;  %p1008_p3 = pneg %p1007_p7 }
  0xc3   : > { %p1014_p10 = por %p1013_p8, %p1012_p6 }
  0xc5   : > { %p1015_p1 = pnand %p1014_p10, %p1008_p3 }
 0x139   : > { %v324_v13 = vpop.permute.xlu0 %323 }
 0x13a   : > { %v334_v14 = vpop.permute.xlu1 %333 }
 0x13d   : > { %v329_v15 = vpop.permute.xlu0 %328 }
 0x13e   : > { %v339_v21 = vpop.permute.xlu1 %338 }
 0x141   : > { %v456_v36 = vpop.permute.xlu0 %455 }
 0x18e   : > { %v715_v16 = vpop.f32.mrb[0].mxu0 }
 0x18f   : > { %v430_v17 = vadd.f32 %v715_v16, %v329_v15  ;;  %v424_v18 = vpop.f32.mrb[1].mxu0 }
 0x190   : > { %v425_v19 = vadd.f32 %v424_v18, %v324_v13 }
 0x191   : > { %v444_v20 = vmax.f32 %v430_v17, 0.0 }
 0x192   : > { %v443_v22 = vmax.f32 %v425_v19, 0.0  ;;  %v718_v23 = vpop.f32.mrb[2].mxu0 }
 0x193   : > { %v448_v24 = vmin.f32 %v444_v20, 6.0  ;;  %v440_v25 = vadd.f32 %v718_v23, %v339_v21  ;;  %v434_v26 = vpop.f32.mrb[3].mxu0 }
 0x194   : > { %v447_v27 = vmin.f32 %v443_v22, 6.0  ;;  %v435_v28 = vadd.f32 %v434_v26, %v334_v14 }
 0x195   : > { %v446_v29 = vmax.f32 %v440_v25, 0.0 }
 0x196   : > { %v445_v30 = vmax.f32 %v435_v28, 0.0  ;;  %v731_v31 = vpack.c.bf16 %v448_v24, %v447_v27 }
 0x197   : > { %v450_v32 = vmin.f32 %v446_v29, 6.0 }
 0x198   : > { %v449_v33 = vmin.f32 %v445_v30, 6.0  ;;  %732 = vmatpush3.bf16.msra.mxu1 %v731_v31 }
 0x199   : > { %733 = vmatprep.subr.bf16.mxu1 %v1121_v11 }
 0x19a   : > { %v734_v34 = vpack.c.bf16 %v450_v32, %v449_v33 }
 0x19c   : > { %735 = vmatpush3.bf16.msra.mxu1 %v734_v34 }
 0x19f   : > { %728 = vmatmul.mubr.msk.f32.vlgmr.msra.gmra.mrb[0].mxu1 %vm458_vm3, %v451_v35 }
 0x272   : > { %v528_v37 = vpop.f32.mrb[0].mxu1 }
 0x273   : > { %v529_v38 = vadd.f32 %v528_v37, %v456_v36  ;;  %v729_v39 = vpop.f32.mrb[1].mxu1 }
 0x275   : > { %532 = vst [vmem:[%s311_s13] sm:$0xf] %v529_v38 }
 0x276   : > { %1018 = shalt.err (!%p1015_p1)
}
 0x277   : > { %s1019_s10 = scalar_lea.hbm %s1432_s30, 64  ;;  %s1023_s29 = scalar_lea.hbm %s1518_s12, 256 }
 0x278   : > { %p1020_p11 = scmp.ne.s32.totalorder %s1432_s30, %s1019_s10  ;;  %p1024_p4 = scmp.lt.u32.totalorder %s1432_s30, %s1518_s12 }
 0x279   : > { %p1025_p12 = scmp.lt.u32.totalorder %s1023_s29, %s1019_s10  ;;  %p1027_p0 = scmp.lt.u32.totalorder %s1019_s10, %s1432_s30 }
 0x27a   : > { %p1021_p5 = pnand %p1020_p11, %p1519_p9 }
 0x27b   : > { %p1026_p2 = por %p1025_p12, %p1024_p4 }
 0x27c   : > { %p1022_p13 = pneg %p1021_p5 }
 0x27d   : > { %p1028_p7 = por %p1027_p0, %p1026_p2 }
 0x27f   : > { %p1029_p3 = pnand %p1028_p7, %p1022_p13 }
 0x281   : > { %1032 = shalt.err (!%p1029_p3)
}
 0x282   : > { %754 = dma.vmem_to_hbm [thread:$0]  (%p1519_p9), %s1434_s26, 64, %s1432_s30, %s534_s21  }
 0x283 PF: > { %p786_p6 = scmp.ge.s32.totalorder %s1111_s25, 2  ;;  %s561_s28 = sand.u32 1, %s1083_s18  }
 0x284   : > { %p1520_p8 = scmp.ne.s32.totalorder %s1514_s7, 0  ;;  %s562_s13 = scalar_lea.sflag [#allocation4], %s561_s28 }
 0x286   : > { %p774_p10 = pnand %p786_p6, %p1520_p8 }
 0x288   : > { %1078 = dma.done.wait (!%p774_p10), %s562_s13, 64  }
 0x289   : > { %1080 = vsyncadd (!%p774_p10), %s562_s13, 4294967232  ;;  %s23_s25 = sadd.s32 1, %s1111_s25   ;;  %s1521_s18 = smov %s1087_s19 }
 0x28a   : > { %p20_p1 = scmp.ge.s32.totalorder %s23_s25, 6   ;;  %s1522_s19 = smov %s1091_s20 }
 0x28b   : > { %s1523_s20 = smov %s1358_s9  ;;  %s1524_s21 = smov %s1103_s23 }
 0x28c   : > { %s1525_s22 = smov %s1107_s24  ;;  %s1526_s23 = smov %s1529_s16 }
 0x28d   : > { %s1527_s24 = smov %s1533_s6  ;;  %22 = sbr.rel (!%p20_p1) target bundleno = 14 (0xe), region = 101 }
 0x294   :  { %567 = vsyncpa [#allocation3], 1 }
 0x295   :  { %569 = vsyncpa [#allocation3 + $0x1], 1 }
 0x296   :  { %570 = vsyncpa [#allocation6], 1 }
 0x297   :  { %571 = vsyncpa [#allocation9], 1 }
 0x298   :  { %572 = vsyncpa [#allocation4], 1 }
 0x299   :  { %574 = vsyncpa [#allocation4 + $0x1], 1 }

</bundles_post_ra>
